<compile_context>
chip_gen: v7x
topology: tpu7x:2x2x1
jax: 0.10.0
libtpu: 0.0.40
codegen_flags: <defaults>
</compile_context>

<pallas_src>
import functools
import numpy as np
import jax
import jax.numpy as jnp
from jax.experimental import pallas as pl
from jax.experimental.pallas import tpu as pltpu

LRELU_SLOPE = 0.1      # cfgfile.ACTIVATION == 'lrelu'
S_LIST = (16, 8, 4)    # synthetic cfgfile.S
LANE = 128


def _round_up(x, m):
    return ((x + m - 1) // m) * m


def _pool_matrix(in_size, out_size):
    """AdaptiveAvgPool1d boundaries as a (out, in) averaging matrix."""
    P = np.zeros((out_size, in_size), np.float32)
    for i in range(out_size):
        s = (i * in_size) // out_size
        e = -((-(i + 1) * in_size) // out_size)  # ceil division
        P[i, s:e] = 1.0 / (e - s)
    return P


@functools.lru_cache(maxsize=None)
def _pool_flat_matrix(H, W, S, HWP):
    """(S*S, HWP) adaptive-avg-pool matrix over flattened HxW positions.

    Columns >= H*W (row padding of the im2col buffer) get weight 0, so any
    garbage computed on padded rows never reaches the output.
    """
    PH = _pool_matrix(H, S)
    PW = _pool_matrix(W, S)
    pfull = np.einsum("ih,jw->ijhw", PH, PW).reshape(S * S, H * W)
    out = np.zeros((S * S, HWP), np.float32)
    out[:, : H * W] = pfull
    return out


def _scale_pred_kernel(xcol_ref, w1_ref, sh1_ref, w2_ref, b2_ref, pflat_ref,
                       o_ref):
    # One image per grid step (grid=(B,), "parallel").
    #   xcol_ref:  (1, HWP, KP)   bf16  im2col of the replicate-padded image
    #   w1_ref:    (KP, C1P)      bf16  3x3 conv weights * BN scale (zero-padded)
    #   sh1_ref:   (1, C1P)       f32   folded BatchNorm shift
    #   w2_ref:    (C1P, C2P)     bf16  1x1 conv weights (zero-padded to 128x128)
    #   b2_ref:    (1, C2P)       f32   1x1 conv bias (zero-padded)
    #   pflat_ref: (SS, HWP)      bf16  adaptive-avg-pool matrix
    #   o_ref:     (1, SS, C2P)   f32   lane-dense output block
    #
    # ---- 3x3 conv (replicate pad) as a single K = 9*Cin matmul --------------
    y = jnp.dot(xcol_ref[0], w1_ref[...], preferred_element_type=jnp.float32)
    # ---- BN shift (scale already folded into w1) + LeakyReLU(0.1), f32 VPU ---
    y = y + sh1_ref[...]
    y = jnp.where(y > 0.0, y, LRELU_SLOPE * y).astype(jnp.bfloat16)
    # ---- adaptive avg-pool BEFORE the 1x1 conv (both linear) -----------------
    pooled = jnp.dot(pflat_ref[...], y, preferred_element_type=jnp.float32)
    # ---- 1x1 conv + bias; 128-wide lane-dense store ---------------------------
    o_ref[0] = jnp.dot(pooled.astype(jnp.bfloat16), w2_ref[...],
                       preferred_element_type=jnp.float32) + b2_ref[...]
    # TODO(synk): at real YOLO head sizes (Cin 128-512, H=W ~52) tile the HWP
    # dimension and accumulate `pooled += pflat_chunk @ y_chunk`, single-buffer
    # the grid-invariant operands (pipeline_mode=pl.Buffered(1)) and set
    # vmem_limit_bytes explicitly -- required on v7x's 64 MiB VMEM.


def make_scale_prediction(params, in_channels, num_classes, rep):
    """Fold parameters once and return a jitted forward(x_nchw) callable."""
    Cin = in_channels
    C1 = 2 * Cin
    C2 = 3 * (num_classes + 5)
    S = S_LIST[rep]
    SS = S * S
    K = 9 * Cin
    KP = _round_up(K, LANE)
    C1P = _round_up(C1, LANE)
    C2P = _round_up(C2, LANE)

    # -------- one-time host-side parameter folding (cached across calls) -----
    eps = 1e-5
    bn_scale = params["bn_gamma"] / jnp.sqrt(params["bn_var"] + eps)
    bn_shift = params["bn_beta"] - params["bn_mean"] * bn_scale

    # 3x3 conv weights as a (9*Cin, C1) matmul operand, tap-major / channel-minor
    # (matches the im2col patch order); BN scale folded into the output channels.
    w1_mat = jnp.transpose(params["w1"], (2, 3, 1, 0)).reshape(K, C1) * bn_scale
    w1_p = jnp.pad(w1_mat, ((0, KP - K), (0, C1P - C1))).astype(jnp.bfloat16)
    sh1 = jnp.pad(bn_shift, (0, C1P - C1)).reshape(1, C1P).astype(jnp.float32)

    # 1x1 conv (with bias), zero-padded so the output store is lane-dense.
    w2_m = params["w2"].reshape(C2, C1).T
    w2_p = jnp.pad(w2_m, ((0, C1P - C1), (0, C2P - C2))).astype(jnp.bfloat16)
    b2_p = jnp.pad(params["b2"].reshape(1, C2),
                   ((0, 0), (0, C2P - C2))).astype(jnp.float32)

    @jax.jit
    def forward(x_nchw):
        B, cin_in, H, W = x_nchw.shape
        assert cin_in == Cin
        HW = H * W
        HWP = _round_up(HW, LANE)

        # ---- plain-JAX glue: replicate pad + im2col, shipped as bf16 ---------
        x_nhwc = jnp.transpose(x_nchw, (0, 2, 3, 1))
        xp = jnp.pad(x_nhwc, ((0, 0), (1, 1), (1, 1), (0, 0)), mode="edge")
        patches = [xp[:, ky:ky + H, kx:kx + W, :]
                   for ky in range(3) for kx in range(3)]
        xcol = jnp.concatenate(patches, axis=-1).reshape(B, HW, K)
        xcol = jnp.pad(xcol, ((0, 0), (0, HWP - HW),
                              (0, KP - K))).astype(jnp.bfloat16)

        # pool matrix: numpy work happens once per shape at trace time (cached)
        pflat = jnp.asarray(_pool_flat_matrix(H, W, S, HWP), dtype=jnp.bfloat16)

        # ---- Pallas hot path: grid over the batch ----------------------------
        out_p = pl.pallas_call(
            _scale_pred_kernel,
            out_shape=jax.ShapeDtypeStruct((B, SS, C2P), jnp.float32),
            grid=(B,),
            in_specs=[
                pl.BlockSpec((1, HWP, KP), lambda b: (b, 0, 0)),
                pl.BlockSpec((KP, C1P), lambda b: (0, 0)),
                pl.BlockSpec((1, C1P), lambda b: (0, 0)),
                pl.BlockSpec((C1P, C2P), lambda b: (0, 0)),
                pl.BlockSpec((1, C2P), lambda b: (0, 0)),
                pl.BlockSpec((SS, HWP), lambda b: (0, 0)),
            ],
            out_specs=pl.BlockSpec((1, SS, C2P), lambda b: (b, 0, 0)),
            compiler_params=pltpu.CompilerParams(
                dimension_semantics=("parallel",)),
        )(xcol, w1_p, sh1, w2_p, b2_p, pflat)

        # ---- final slice/reshape/permute (matches PyTorch) -------------------
        out = out_p[:, :, :C2]
        return out.reshape(B, S, S, 3, num_classes + 5).transpose(0, 3, 1, 2, 4)

    return forward


# ------------------------------ reference (pure jnp, f32) ---------------------
def _im2col3x3_replicate(x_nhwc):
    B, H, W, C = x_nhwc.shape
    xp = jnp.pad(x_nhwc, ((0, 0), (1, 1), (1, 1), (0, 0)), mode="edge")
    patches = []
    for ky in range(3):
        for kx in range(3):
            patches.append(xp[:, ky:ky + H, kx:kx + W, :])
    return jnp.concatenate(patches, axis=-1).reshape(B, H * W, 9 * C)


def _reference(x_nchw, params, num_classes, rep):
    B, Cin, H, W = x_nchw.shape
    C1, C2 = 2 * Cin, 3 * (num_classes + 5)
    S = S_LIST[rep]
    x_nhwc = jnp.transpose(x_nchw, (0, 2, 3, 1))
    xcol = _im2col3x3_replicate(x_nhwc)
    w1_mat = jnp.transpose(params["w1"], (2, 3, 1, 0)).reshape(9 * Cin, C1)
    eps = 1e-5
    bn_scale = params["bn_gamma"] / jnp.sqrt(params["bn_var"] + eps)
    bn_shift = params["bn_beta"] - params["bn_mean"] * bn_scale
    y = jnp.einsum("bpk,kc->bpc", xcol, w1_mat) * bn_scale + bn_shift
    y = jnp.where(y > 0, y, LRELU_SLOPE * y)
    z = jnp.einsum("bpc,cd->bpd", y, params["w2"].reshape(C2, C1).T) + params["b2"]
    PH, PW = _pool_matrix(H, S), _pool_matrix(W, S)
    Pmat = jnp.asarray(np.einsum("ih,jw->ijhw", PH, PW).reshape(S * S, H * W))
    pooled = jnp.einsum("qp,bpd->bqd", Pmat, z)
    return pooled.reshape(B, S, S, 3, num_classes + 5).transpose(0, 3, 1, 2, 4)


def make_params(key, in_channels, num_classes):
    C1 = 2 * in_channels
    C2 = 3 * (num_classes + 5)
    k1, k2, k3 = jax.random.split(key, 3)
    return {
        "w1": 0.1 * jax.random.normal(k1, (C1, in_channels, 3, 3), jnp.float32),
        "bn_gamma": 1.0 + 0.01 * jnp.arange(C1, dtype=jnp.float32),
        "bn_beta": 0.02 * jnp.arange(C1, dtype=jnp.float32),
        "bn_mean": 0.05 * jnp.arange(C1, dtype=jnp.float32),
        "bn_var": 1.0 + 0.1 * jnp.arange(C1, dtype=jnp.float32),
        "w2": 0.1 * jax.random.normal(k2, (C2, C1, 1, 1), jnp.float32),
        "b2": 0.1 * jax.random.normal(k3, (C2,), jnp.float32),
    }


if __name__ == "__main__":
    B, Cin, H, W = 2, 4, 16, 16
    num_classes, rep = 3, 1          # S_LIST[1] == 8 -> adaptive pool 16x16 -> 8x8

    key = jax.random.PRNGKey(0)
    kx_, kp = jax.random.split(key)
    x = jax.random.normal(kx_, (B, Cin, H, W), jnp.float32)   # NCHW like PyTorch
    params = make_params(kp, Cin, num_classes)

    forward = make_scale_prediction(params, Cin, num_classes, rep)
    out = jax.block_until_ready(forward(x))

    ref = _reference(x, params, num_classes, rep)
    S = S_LIST[rep]
    assert out.shape == (B, 3, S, S, num_classes + 5), out.shape
    # bf16 MXU operands + pool-before-1x1 linear reorder -> loosened tolerance
    np.testing.assert_allclose(np.asarray(out), np.asarray(ref), rtol=3e-2, atol=3e-2)

    print("KERNEL_OK")
</pallas_src>

<mosaic_0001>
module attributes {stable_mosaic.version = 11 : i64} {
  func.func @_scale_pred_kernel(%arg0: i32, %arg1: memref<1x256x128xbf16, #tpu.memory_space<vmem>>, %arg2: memref<128x128xbf16, #tpu.memory_space<vmem>>, %arg3: memref<1x128xf32, #tpu.memory_space<vmem>>, %arg4: memref<128x128xbf16, #tpu.memory_space<vmem>>, %arg5: memref<1x128xf32, #tpu.memory_space<vmem>>, %arg6: memref<64x256xbf16, #tpu.memory_space<vmem>>, %arg7: memref<1x64x128xf32, #tpu.memory_space<vmem>>) attributes {dimension_semantics = [#tpu.dimension_semantics<parallel>], iteration_bounds = array<i64: 2>, scalar_prefetch = 0 : i64, scratch_operands = 0 : i64, tpu.core_type = #tpu.core_type<tc>, window_params = [{transform_indices = @transform_0, window_bounds = array<i64: 1, 256, 128>}, {pipeline_mode = #tpu.pipeline_mode<synchronous>, transform_indices = @transform_1, window_bounds = array<i64: 128, 128>}, {pipeline_mode = #tpu.pipeline_mode<synchronous>, transform_indices = @transform_2, window_bounds = array<i64: 1, 128>}, {pipeline_mode = #tpu.pipeline_mode<synchronous>, transform_indices = @transform_3, window_bounds = array<i64: 128, 128>}, {pipeline_mode = #tpu.pipeline_mode<synchronous>, transform_indices = @transform_4, window_bounds = array<i64: 1, 128>}, {pipeline_mode = #tpu.pipeline_mode<synchronous>, transform_indices = @transform_5, window_bounds = array<i64: 64, 256>}, {transform_indices = @transform_6, window_bounds = array<i64: 1, 64, 128>}]} {
    %c0 = arith.constant 0 : index
    %c0_0 = arith.constant 0 : index
    %c0_1 = arith.constant 0 : index
    %0 = vector.load %arg1[%c0, %c0_0, %c0_1] : memref<1x256x128xbf16, #tpu.memory_space<vmem>>, vector<1x256x128xbf16>
    %1 = vector.shape_cast %0 : vector<1x256x128xbf16> to vector<256x128xbf16>
    %c0_2 = arith.constant 0 : index
    %c0_3 = arith.constant 0 : index
    %2 = vector.load %arg2[%c0_2, %c0_3] : memref<128x128xbf16, #tpu.memory_space<vmem>>, vector<128x128xbf16>
    %cst = arith.constant dense<0.000000e+00> : vector<256x128xf32>
    %3 = tpu.matmul %1, %2, %cst {dimension_numbers = #tpu.dot_dimension_numbers<[1], [0], [0], [1], [0, 0, 1, 1], [], []>} : vector<256x128xbf16>, vector<128x128xbf16>, vector<256x128xf32> -> vector<256x128xf32>
    %c0_4 = arith.constant 0 : index
    %c0_5 = arith.constant 0 : index
    %4 = vector.load %arg3[%c0_4, %c0_5] : memref<1x128xf32, #tpu.memory_space<vmem>>, vector<1x128xf32>
    %5 = vector.broadcast %4 : vector<1x128xf32> to vector<256x128xf32>
    %6 = arith.addf %3, %5 : vector<256x128xf32>
    %cst_6 = arith.constant 0.000000e+00 : f32
    %7 = vector.broadcast %cst_6 : f32 to vector<256x128xf32>
    %8 = arith.cmpf ogt, %6, %7 : vector<256x128xf32>
    %cst_7 = arith.constant 1.000000e-01 : f32
    %9 = vector.broadcast %cst_7 : f32 to vector<256x128xf32>
    %10 = arith.mulf %9, %6 : vector<256x128xf32>
    %11 = arith.select %8, %6, %10 : vector<256x128xi1>, vector<256x128xf32>
    %12 = arith.truncf %11 : vector<256x128xf32> to vector<256x128xbf16>
    %c0_8 = arith.constant 0 : index
    %c0_9 = arith.constant 0 : index
    %13 = vector.load %arg6[%c0_8, %c0_9] : memref<64x256xbf16, #tpu.memory_space<vmem>>, vector<64x256xbf16>
    %cst_10 = arith.constant dense<0.000000e+00> : vector<64x128xf32>
    %14 = tpu.matmul %13, %12, %cst_10 {dimension_numbers = #tpu.dot_dimension_numbers<[1], [0], [0], [1], [0, 0, 1, 1], [], []>} : vector<64x256xbf16>, vector<256x128xbf16>, vector<64x128xf32> -> vector<64x128xf32>
    %15 = arith.truncf %14 : vector<64x128xf32> to vector<64x128xbf16>
    %c0_11 = arith.constant 0 : index
    %c0_12 = arith.constant 0 : index
    %16 = vector.load %arg4[%c0_11, %c0_12] : memref<128x128xbf16, #tpu.memory_space<vmem>>, vector<128x128xbf16>
    %cst_13 = arith.constant dense<0.000000e+00> : vector<64x128xf32>
    %17 = tpu.matmul %15, %16, %cst_13 {dimension_numbers = #tpu.dot_dimension_numbers<[1], [0], [0], [1], [0, 0, 1, 1], [], []>} : vector<64x128xbf16>, vector<128x128xbf16>, vector<64x128xf32> -> vector<64x128xf32>
    %c0_14 = arith.constant 0 : index
    %c0_15 = arith.constant 0 : index
    %18 = vector.load %arg5[%c0_14, %c0_15] : memref<1x128xf32, #tpu.memory_space<vmem>>, vector<1x128xf32>
    %19 = vector.broadcast %18 : vector<1x128xf32> to vector<64x128xf32>
    %20 = arith.addf %17, %19 : vector<64x128xf32>
    %c0_16 = arith.constant 0 : index
    %c0_17 = arith.constant 0 : index
    %c0_18 = arith.constant 0 : index
    %21 = vector.load %arg7[%c0_16, %c0_17, %c0_18] : memref<1x64x128xf32, #tpu.memory_space<vmem>>, vector<1x64x128xf32>
    %22 = vector.shape_cast %21 : vector<1x64x128xf32> to vector<64x128xf32>
    %23 = vector.shape_cast %20 : vector<64x128xf32> to vector<1x64x128xf32>
    tpu.vector_store %arg7[%c0_16, %c0_17, %c0_18], %23 {strides = array<i32>} : memref<1x64x128xf32, #tpu.memory_space<vmem>>, vector<1x64x128xf32>,
    return
  }
  func.func @transform_0(%arg0: i32) -> (i32, i32, i32) {
    %c0_i32 = arith.constant 0 : i32
    %c0_i32_0 = arith.constant 0 : i32
    %c0_i32_1 = arith.constant 0 : i32
    return %arg0, %c0_i32, %c0_i32_0 : i32, i32, i32
  }
  func.func @transform_1(%arg0: i32) -> (i32, i32) {
    %c0_i32 = arith.constant 0 : i32
    %c0_i32_0 = arith.constant 0 : i32
    %c0_i32_1 = arith.constant 0 : i32
    return %c0_i32, %c0_i32_0 : i32, i32
  }
  func.func @transform_2(%arg0: i32) -> (i32, i32) {
    %c0_i32 = arith.constant 0 : i32
    %c0_i32_0 = arith.constant 0 : i32
    %c0_i32_1 = arith.constant 0 : i32
    return %c0_i32, %c0_i32_0 : i32, i32
  }
  func.func @transform_3(%arg0: i32) -> (i32, i32) {
    %c0_i32 = arith.constant 0 : i32
    %c0_i32_0 = arith.constant 0 : i32
    %c0_i32_1 = arith.constant 0 : i32
    return %c0_i32, %c0_i32_0 : i32, i32
  }
  func.func @transform_4(%arg0: i32) -> (i32, i32) {
    %c0_i32 = arith.constant 0 : i32
    %c0_i32_0 = arith.constant 0 : i32
    %c0_i32_1 = arith.constant 0 : i32
    return %c0_i32, %c0_i32_0 : i32, i32
  }
  func.func @transform_5(%arg0: i32) -> (i32, i32) {
    %c0_i32 = arith.constant 0 : i32
    %c0_i32_0 = arith.constant 0 : i32
    %c0_i32_1 = arith.constant 0 : i32
    return %c0_i32, %c0_i32_0 : i32, i32
  }
  func.func @transform_6(%arg0: i32) -> (i32, i32, i32) {
    %c0_i32 = arith.constant 0 : i32
    %c0_i32_0 = arith.constant 0 : i32
    %c0_i32_1 = arith.constant 0 : i32
    return %arg0, %c0_i32, %c0_i32_0 : i32, i32, i32
  }
}

</mosaic_0001>

<bundles_post_ra>
// kernel: forward.1
= control target key start
LH: loop header
LB: loop body
LE: loop exit
PB: predicated region body
PF: predicated region fallthrough
CT: control target
= control target key end

     0   :  { %s1339_s21 = smov 0   ;;  %s1562_s0 = inlined_call_operand.vmem [shape: bf16[2,256,128], index: 0, kind: input, shape index: {}]   ;;  %s1563_s1 = inlined_call_operand.vmem [shape: bf16[128,128], index: 1, kind: input, shape index: {}]   ;;  %s1564_s2 = inlined_call_operand.vmem [shape: f32[1,128], index: 2, kind: input, shape index: {}]   ;;  %s1565_s3 = inlined_call_operand.vmem [shape: bf16[128,128], index: 3, kind: input, shape index: {}]   ;;  %s1566_s4 = inlined_call_operand.vmem [shape: f32[1,128], index: 4, kind: input, shape index: {}]   ;;  %s1567_s5 = inlined_call_operand.vmem [shape: bf16[64,256], index: 5, kind: input, shape index: {}]   ;;  %s1568_s6 = inlined_call_operand.vmem [shape: f32[2,64,128], index: 6, kind: output, shape index: {}]  }
   0x1 LB: > { %s1041_s22 = sadd.s32 4294967295, %s1302_s21   ;;  %p1045_p0 = scmp.ge.s32.totalorder %s1302_s21, 1  ;;  %s1302_s21 = sphi %s1339_s21, %s16_s21  }
   0x2   : > { %p212_p1 = scmp.lt.s32.totalorder %s1302_s21, 3 }
   0x4   : > { %p213_p2 = pnand %p1045_p0, %p212_p1 }
   0x5   : > { %v1252_v0 = vld [vmem:[%s1563_s1] sm:$0xff] (!%p213_p2)   ;;  %p242_p3 = scmp.lt.s32.totalorder (!%p213_p2), %s1041_s22, 1  ;;  %v1253_v1 = vld [vmem:[%s1563_s1 + $0x8] sm:$0xff] (!%p213_p2)   ;;  %v1254_v2 = vld [vmem:[%s1563_s1 + $0x10] sm:$0xff] (!%p213_p2)  }
   0x6   : > { %216 = sbr.rel (%p213_p2) target bundleno = 785 (0x311), region = 44  ;;  %1172 = vmatprep.subr.bf16.mxu0 (!%p213_p2), %v1252_v0  ;;  %v1255_v3 = vld [vmem:[%s1563_s1 + $0x18] sm:$0xff] (!%p213_p2)   ;;  %v1256_v5 = vld [vmem:[%s1563_s1 + $0x20] sm:$0xff] (!%p213_p2)   ;;  %v1257_v6 = vld [vmem:[%s1563_s1 + $0x28] sm:$0xff] (!%p213_p2)  }
   0x7   : > { %1173 = vmatpush3.bf16.msra.mxu0 (!%p213_p2), %v1252_v0  ;;  %v1258_v7 = vld [vmem:[%s1563_s1 + $0x30] sm:$0xff] (!%p213_p2)   ;;  %v1259_v8 = vld [vmem:[%s1563_s1 + $0x38] sm:$0xff] (!%p213_p2)   ;;  %v1278_v24 = vld [vmem:[%s1567_s5 + $0x4] ss:$8 sps:$4 sm:$0xff] (!%p213_p2)  }
   0x8   : > { %1174 = vmatprep.subr.bf16.mxu0 (!%p213_p2), %v1253_v1  ;;  %805 = vmatprep.mubr.bf16.mxu1 (!%p213_p2), %v1278_v24  ;;  %v1401_v25 = vld [vmem:[%s1564_s2] ss:$0 sm:$0xff] (!%p213_p2) }
   0xb   : > { %1175 = vmatpush3.bf16.msra.mxu0 (!%p213_p2), %v1253_v1 }
   0xc   : > { %1176 = vmatprep.subr.bf16.mxu0 (!%p213_p2), %v1254_v2 }
   0xd   : > { %s1570_s22 = smov (!%p242_p3, %s1041_s22), 1 }
   0xe   : > { %s1094_s29 = sshll.u32 %s1570_s22, 7  ;;  %s1095_s9 = sshll.u32 %s1570_s22, 6 }
   0xf   : > { %s1362_s8 = scalar_lea.vmem %s1562_s0, %s1094_s29  ;;  %1177 = vmatpush3.bf16.msra.mxu0 %v1254_v2  ;;  %s251_s14 = scalar_lea.vmem %s1568_s6, %s1095_s9 }
  0x10   : > { %v1260_v4 = vld [vmem:[%s1362_s8] sm:$0xff]   ;;  %1178 = vmatprep.subr.bf16.mxu0 %v1255_v3  ;;  %v1261_v9 = vld [vmem:[%s1362_s8 + $0x8] sm:$0xff]   ;;  %v1262_v10 = vld [vmem:[%s1362_s8 + $0x10] sm:$0xff]  }
  0x11   : > { %1188 = vmatprep.mubr.bf16.mxu0 %v1260_v4  ;;  %v1263_v11 = vld [vmem:[%s1362_s8 + $0x18] sm:$0xff]   ;;  %v1264_v12 = vld [vmem:[%s1362_s8 + $0x20] sm:$0xff]   ;;  %v1265_v13 = vld [vmem:[%s1362_s8 + $0x28] sm:$0xff]  }
  0x12   : > { %v1266_v14 = vld [vmem:[%s1362_s8 + $0x30] sm:$0xff]   ;;  %v1267_v15 = vld [vmem:[%s1362_s8 + $0x38] sm:$0xff]   ;;  %v1268_v16 = vld [vmem:[%s1362_s8 + $0x40] sm:$0xff]  }
  0x13   : > { %1179 = vmatpush3.bf16.msra.mxu0 %v1255_v3  ;;  %v1269_v17 = vld [vmem:[%s1362_s8 + $0x48] sm:$0xff]   ;;  %v1270_v18 = vld [vmem:[%s1362_s8 + $0x50] sm:$0xff]   ;;  %v1271_v19 = vld [vmem:[%s1362_s8 + $0x58] sm:$0xff]  }
  0x14   : > { %1180 = vmatprep.subr.bf16.mxu0 %v1256_v5  ;;  %v1272_v20 = vld [vmem:[%s1362_s8 + $0x60] sm:$0xff]   ;;  %v1273_v21 = vld [vmem:[%s1362_s8 + $0x68] sm:$0xff]   ;;  %v1274_v22 = vld [vmem:[%s1362_s8 + $0x70] sm:$0xff]  }
  0x15   : > { %v1275_v23 = vld [vmem:[%s1362_s8 + $0x78] sm:$0xff]  }
  0x17   : > { %1181 = vmatpush3.bf16.msra.mxu0 %v1256_v5 }
  0x18   : > { %1182 = vmatprep.subr.bf16.mxu0 %v1257_v6 }
  0x1b   : > { %1183 = vmatpush3.bf16.msra.mxu0 %v1257_v6 }
  0x1c   : > { %1184 = vmatprep.subr.bf16.mxu0 %v1258_v7 }
  0x1f   : > { %1185 = vmatpush3.bf16.msra.mxu0 %v1258_v7 }
  0x20   : > { %1186 = vmatprep.subr.bf16.mxu0 %v1259_v8 }
  0x23   : > { %1187 = vmatpush3.bf16.msra.mxu0 %v1259_v8 }
  0x26   : > { %1189 = vmatmul.mubr.bf16.vlgmr.msra.gmra.mrb[0].mxu0 %v1261_v9 }
  0x27   : > { %1192 = vmatprep.mubr.bf16.mxu0 %v1262_v10 }
  0x2e   : > { %1193 = vmatmul.mubr.bf16.gmra.mrb[4].mxu0 %v1263_v11 }
  0x2f   : > { %1196 = vmatprep.mubr.bf16.mxu0 %v1264_v12 }
  0x36   : > { %1197 = vmatmul.mubr.bf16.gmra.mrb[8].mxu0 %v1265_v13 }
  0x37   : > { %1200 = vmatprep.mubr.bf16.mxu0 %v1266_v14 }
  0x3e   : > { %1201 = vmatmul.mubr.bf16.gmra.mrb[12].mxu0 %v1267_v15 }
  0x3f   : > { %1204 = vmatprep.mubr.bf16.mxu0 %v1268_v16 }
  0x46   : > { %1205 = vmatmul.mubr.bf16.gmra.mrb[16].mxu0 %v1269_v17 }
  0x47   : > { %1208 = vmatprep.mubr.bf16.mxu0 %v1270_v18 }
  0x4e   : > { %1209 = vmatmul.mubr.bf16.gmra.mrb[20].mxu0 %v1271_v19 }
  0x4f   : > { %1212 = vmatprep.mubr.bf16.mxu0 %v1272_v20 }
  0x56   : > { %1213 = vmatmul.mubr.bf16.gmra.mrb[24].mxu0 %v1273_v21 }
  0x57   : > { %1216 = vmatprep.mubr.bf16.mxu0 %v1274_v22 }
  0x5e   : > { %1217 = vmatmul.mubr.bf16.gmra.mrb[28].mxu0 %v1275_v23 }
  0xf9   : > { %v1190_v26 = vpop.f32.mrb[0].mxu0 }
  0xfa   : > { %v495_v27 = vadd.f32 %v1190_v26, %v1401_v25  ;;  %v486_v28 = vpop.f32.mrb[1].mxu0 }
  0xfb   : > { %v487_v29 = vadd.f32 %v1401_v25, %v486_v28  ;;  %v1191_v30 = vpop.f32.mrb[2].mxu0 }
  0xfc   : > { %v647_v31 = vmul.f32 0.1, %v495_v27  ;;  %v498_v32 = vadd.f32 %v1191_v30, %v1401_v25  ;;  %v489_v33 = vpop.f32.mrb[3].mxu0  ;;  %vm615_vm0 = vcmp.gt.f32.partialorder %v495_v27, 0.0 }
  0xfd   : > { %v645_v34 = vmul.f32 0.1, %v487_v29  ;;  %v490_v35 = vadd.f32 %v1401_v25, %v489_v33  ;;  %vm613_vm2 = vcmp.gt.f32.partialorder %v487_v29, 0.0 }
  0xfe   : > { %vm616_vm1 = vcmp.gt.f32.partialorder %v498_v32, 0.0  ;;  %v648_v36 = vmul.f32 0.1, %v498_v32  ;;  %v1407_v38 = vsel %vm615_vm0, %v495_v27, %v647_v31 }
  0xff   : > { %v646_v37 = vmul.f32 0.1, %v490_v35  ;;  %vm614_vm3 = vcmp.gt.f32.partialorder %v490_v35, 0.0  ;;  %v1411_v41 = vsel %vm613_vm2, %v487_v29, %v645_v34 }
 0x100   : > { %v1409_v39 = vsel %vm616_vm1, %v498_v32, %v648_v36 }
 0x101   : > { %v1194_v40 = vpop.f32.mrb[4].mxu0  ;;  %v1413_v42 = vsel %vm614_vm3, %v490_v35, %v646_v37  ;;  %v710_v43 = vpack.c.bf16 %v1409_v39, %v1407_v38 }
 0x102   : > { %v511_v44 = vadd.f32 %v1194_v40, %v1401_v25  ;;  %v502_v45 = vpop.f32.mrb[5].mxu0  ;;  %v709_v46 = vpack.c.bf16 %v1413_v42, %v1411_v41 }
 0x103   : > { %v503_v47 = vadd.f32 %v1401_v25, %v502_v45  ;;  %v1195_v48 = vpop.f32.mrb[6].mxu0 }
 0x104   : > { %v651_v49 = vmul.f32 0.1, %v511_v44  ;;  %v514_v50 = vadd.f32 %v1195_v48, %v1401_v25  ;;  %v505_v51 = vpop.f32.mrb[7].mxu0  ;;  %vm619_vm4 = vcmp.gt.f32.partialorder %v511_v44, 0.0 }
 0x105   : > { %v649_v52 = vmul.f32 0.1, %v503_v47  ;;  %v506_v53 = vadd.f32 %v1401_v25, %v505_v51  ;;  %vm617_vm5 = vcmp.gt.f32.partialorder %v503_v47, 0.0 }
 0x106   : > { %vm620_vm6 = vcmp.gt.f32.partialorder %v514_v50, 0.0  ;;  %v652_v54 = vmul.f32 0.1, %v514_v50  ;;  %v1423_v56 = vsel %vm619_vm4, %v511_v44, %v651_v49 }
 0x107   : > { %vm618_vm7 = vcmp.gt.f32.partialorder %v506_v53, 0.0  ;;  %v650_v55 = vmul.f32 0.1, %v506_v53  ;;  %v1427_v59 = vsel %vm617_vm5, %v503_v47, %v649_v52 }
 0x108   : > { %v1425_v57 = vsel %vm620_vm6, %v514_v50, %v652_v54 }
 0x109   : > { %v1198_v58 = vpop.f32.mrb[8].mxu0  ;;  %v1429_v60 = vsel %vm618_vm7, %v506_v53, %v650_v55  ;;  %v712_v61 = vpack.c.bf16 %v1425_v57, %v1423_v56 }
 0x10a   : > { %v527_v62 = vadd.f32 %v1198_v58, %v1401_v25  ;;  %v518_v63 = vpop.f32.mrb[9].mxu0  ;;  %v711_v0 = vpack.c.bf16 %v1429_v60, %v1427_v59 }
 0x10b   : > { %v519_v1 = vadd.f32 %v1401_v25, %v518_v63  ;;  %v1199_v2 = vpop.f32.mrb[10].mxu0 }
 0x10c   : > { %v655_v3 = vmul.f32 0.1, %v527_v62  ;;  %v530_v4 = vadd.f32 %v1199_v2, %v1401_v25  ;;  %v521_v5 = vpop.f32.mrb[11].mxu0  ;;  %vm623_vm8 = vcmp.gt.f32.partialorder %v527_v62, 0.0 }
 0x10d   : > { %v653_v6 = vmul.f32 0.1, %v519_v1  ;;  %v522_v7 = vadd.f32 %v1401_v25, %v521_v5  ;;  %vm621_vm9 = vcmp.gt.f32.partialorder %v519_v1, 0.0 }
 0x10e   : > { %vm624_vm10 = vcmp.gt.f32.partialorder %v530_v4, 0.0  ;;  %v656_v8 = vmul.f32 0.1, %v530_v4  ;;  %v1439_v10 = vsel %vm623_vm8, %v527_v62, %v655_v3 }
 0x10f   : > { %vm622_vm11 = vcmp.gt.f32.partialorder %v522_v7, 0.0  ;;  %v654_v9 = vmul.f32 0.1, %v522_v7  ;;  %v1443_v13 = vsel %vm621_vm9, %v519_v1, %v653_v6 }
 0x110   : > { %v1441_v11 = vsel %vm624_vm10, %v530_v4, %v656_v8 }
 0x111   : > { %v1202_v12 = vpop.f32.mrb[12].mxu0  ;;  %v1445_v14 = vsel %vm622_vm11, %v522_v7, %v654_v9  ;;  %v714_v15 = vpack.c.bf16 %v1441_v11, %v1439_v10  ;;  %v1279_v10 = vld [vmem:[%s1567_s5 + $0x14] ss:$8 sps:$4 sm:$0xff]   ;;  %v1289_v11 = vld [vmem:[%s1565_s3 + $0x8] sm:$0xff]  }
 0x112   : > { %v543_v16 = vadd.f32 %v1202_v12, %v1401_v25  ;;  %v534_v17 = vpop.f32.mrb[13].mxu0  ;;  %v713_v18 = vpack.c.bf16 %v1445_v14, %v1443_v13  ;;  %v1288_v13 = vld [vmem:[%s1565_s3] sm:$0xff]  }
 0x113   : > { %v535_v19 = vadd.f32 %v1401_v25, %v534_v17  ;;  %v1203_v20 = vpop.f32.mrb[14].mxu0  ;;  %v1276_v14 = vld [vmem:[%s1567_s5] ss:$8 sps:$4 sm:$0xff]  }
 0x114   : > { %v659_v21 = vmul.f32 0.1, %v543_v16  ;;  %v546_v22 = vadd.f32 %v1203_v20, %v1401_v25  ;;  %v537_v23 = vpop.f32.mrb[15].mxu0  ;;  %vm627_vm12 = vcmp.gt.f32.partialorder %v543_v16, 0.0 }
 0x115   : > { %v657_v24 = vmul.f32 0.1, %v535_v19  ;;  %v538_v26 = vadd.f32 %v1401_v25, %v537_v23  ;;  %vm625_vm13 = vcmp.gt.f32.partialorder %v535_v19, 0.0 }
 0x116   : > { %vm628_vm14 = vcmp.gt.f32.partialorder %v546_v22, 0.0  ;;  %v660_v27 = vmul.f32 0.1, %v546_v22  ;;  %v1455_v29 = vsel %vm627_vm12, %v543_v16, %v659_v21 }
 0x117   : > { %vm626_vm15 = vcmp.gt.f32.partialorder %v538_v26, 0.0  ;;  %v658_v28 = vmul.f32 0.1, %v538_v26  ;;  %v1459_v32 = vsel %vm625_vm13, %v535_v19, %v657_v24 }
 0x118   : > { %v1457_v30 = vsel %vm628_vm14, %v546_v22, %v660_v27 }
 0x119   : > { %v1206_v31 = vpop.f32.mrb[16].mxu0  ;;  %v1461_v33 = vsel %vm626_vm15, %v538_v26, %v658_v28  ;;  %v716_v34 = vpack.c.bf16 %v1457_v30, %v1455_v29  ;;  %v1282_v29 = vld [vmem:[%s1567_s5 + $0x24] ss:$8 sps:$4 sm:$0xff]   ;;  %v1291_v30 = vld [vmem:[%s1565_s3 + $0x18] sm:$0xff]  }
 0x11a   : > { %v559_v35 = vadd.f32 %v1206_v31, %v1401_v25  ;;  %v550_v36 = vpop.f32.mrb[17].mxu0  ;;  %v715_v37 = vpack.c.bf16 %v1461_v33, %v1459_v32  ;;  %v1284_v32 = vld [vmem:[%s1567_s5 + $0x20] ss:$8 sps:$4 sm:$0xff]   ;;  %v1285_v33 = vld [vmem:[%s1567_s5 + $0x34] ss:$8 sps:$4 sm:$0xff]  }
 0x11b   : > { %v551_v40 = vadd.f32 %v1401_v25, %v550_v36  ;;  %v1207_v44 = vpop.f32.mrb[18].mxu0 }
 0x11c   : > { %v663_v45 = vmul.f32 0.1, %v559_v35  ;;  %v562_v47 = vadd.f32 %v1207_v44, %v1401_v25  ;;  %v553_v48 = vpop.f32.mrb[19].mxu0  ;;  %vm631_vm0 = vcmp.gt.f32.partialorder %v559_v35, 0.0 }
 0x11d   : > { %v661_v49 = vmul.f32 0.1, %v551_v40  ;;  %v554_v50 = vadd.f32 %v1401_v25, %v553_v48  ;;  %vm629_vm2 = vcmp.gt.f32.partialorder %v551_v40, 0.0 }
 0x11e   : > { %vm632_vm1 = vcmp.gt.f32.partialorder %v562_v47, 0.0  ;;  %v664_v51 = vmul.f32 0.1, %v562_v47  ;;  %v695_v53 = vsel %vm631_vm0, %v559_v35, %v663_v45 }
 0x11f   : > { %v662_v52 = vmul.f32 0.1, %v554_v50  ;;  %vm630_vm3 = vcmp.gt.f32.partialorder %v554_v50, 0.0  ;;  %v693_v58 = vsel %vm629_vm2, %v551_v40, %v661_v49 }
 0x120   : > { %v696_v54 = vsel %vm632_vm1, %v562_v47, %v664_v51 }
 0x121   : > { %v1210_v55 = vpop.f32.mrb[20].mxu0  ;;  %v694_v62 = vsel %vm630_vm3, %v554_v50, %v662_v52  ;;  %v718_v63 = vpack.c.bf16 %v696_v54, %v695_v53 }
 0x122   : > { %v575_v1 = vadd.f32 %v1210_v55, %v1401_v25  ;;  %v566_v2 = vpop.f32.mrb[21].mxu0  ;;  %v717_v3 = vpack.c.bf16 %v694_v62, %v693_v58 }
 0x123   : > { %v567_v4 = vadd.f32 %v1401_v25, %v566_v2  ;;  %v1211_v5 = vpop.f32.mrb[22].mxu0 }
 0x124   : > { %v667_v6 = vmul.f32 0.1, %v575_v1  ;;  %v578_v7 = vadd.f32 %v1211_v5, %v1401_v25  ;;  %v569_v8 = vpop.f32.mrb[23].mxu0  ;;  %1120 = vmatprep.subr.bf16.mxu1 %v717_v3  ;;  %vm635_vm4 = vcmp.gt.f32.partialorder %v575_v1, 0.0  ;;  %v1293_v3 = vld [vmem:[%s1565_s3 + $0x28] sm:$0xff]   ;;  %v1295_v5 = vld [vmem:[%s1565_s3 + $0x38] sm:$0xff]  }
 0x125   : > { %v665_v9 = vmul.f32 0.1, %v567_v4  ;;  %v570_v12 = vadd.f32 %v1401_v25, %v569_v8  ;;  %1121 = vmatpush3.bf16.msra.mxu1 %v709_v46  ;;  %vm633_vm5 = vcmp.gt.f32.partialorder %v567_v4, 0.0 }
 0x126   : > { %vm636_vm6 = vcmp.gt.f32.partialorder %v578_v7, 0.0  ;;  %v668_v16 = vmul.f32 0.1, %v578_v7  ;;  %1122 = vmatprep.subr.bf16.mxu1 %v718_v63  ;;  %v699_v19 = vsel %vm635_vm4, %v575_v1, %v667_v6 }
 0x127   : > { %vm634_vm7 = vcmp.gt.f32.partialorder %v570_v12, 0.0  ;;  %v666_v17 = vmul.f32 0.1, %v570_v12  ;;  %v697_v22 = vsel %vm633_vm5, %v567_v4, %v665_v9  ;;  %v1294_v4 = vld [vmem:[%s1565_s3 + $0x30] sm:$0xff]  }
 0x128   : > { %v700_v20 = vsel %vm636_vm6, %v578_v7, %v668_v16 }
 0x129   : > { %v1214_v21 = vpop.f32.mrb[24].mxu0  ;;  %1123 = vmatpush3.bf16.msra.mxu1 %v710_v43  ;;  %v698_v23 = vsel %vm634_vm7, %v570_v12, %v666_v17  ;;  %v720_v24 = vpack.c.bf16 %v700_v20, %v699_v19 }
 0x12a   : > { %v591_v26 = vadd.f32 %v1214_v21, %v1401_v25  ;;  %v582_v41 = vpop.f32.mrb[25].mxu0  ;;  %v719_v42 = vpack.c.bf16 %v698_v23, %v697_v22 }
 0x12b   : > { %v583_v46 = vadd.f32 %v1401_v25, %v582_v41  ;;  %v1215_v27 = vpop.f32.mrb[26].mxu0 }
 0x12c   : > { %v671_v28 = vmul.f32 0.1, %v591_v26  ;;  %v594_v31 = vadd.f32 %v1215_v27, %v1401_v25  ;;  %v585_v35 = vpop.f32.mrb[27].mxu0  ;;  %1124 = vmatprep.subr.bf16.mxu1 %v719_v42  ;;  %vm639_vm8 = vcmp.gt.f32.partialorder %v591_v26, 0.0 }
 0x12d   : > { %v669_v36 = vmul.f32 0.1, %v583_v46  ;;  %v586_v38 = vadd.f32 %v1401_v25, %v585_v35  ;;  %1125 = vmatpush3.bf16.msra.mxu1 %v711_v0  ;;  %vm637_vm9 = vcmp.gt.f32.partialorder %v583_v46, 0.0 }
 0x12e   : > { %vm640_vm10 = vcmp.gt.f32.partialorder %v594_v31, 0.0  ;;  %v672_v39 = vmul.f32 0.1, %v594_v31  ;;  %1126 = vmatprep.subr.bf16.mxu1 %v720_v24  ;;  %v703_v40 = vsel %vm639_vm8, %v591_v26, %v671_v28 }
 0x12f   : > { %vm638_vm11 = vcmp.gt.f32.partialorder %v586_v38, 0.0  ;;  %v670_v43 = vmul.f32 0.1, %v586_v38  ;;  %v701_v47 = vsel %vm637_vm9, %v583_v46, %v669_v36 }
 0x130   : > { %v704_v44 = vsel %vm640_vm10, %v594_v31, %v672_v39 }
 0x131   : > { %v1218_v45 = vpop.f32.mrb[28].mxu0  ;;  %1127 = vmatpush3.bf16.msra.mxu1 %v712_v61  ;;  %v702_v48 = vsel %vm638_vm11, %v586_v38, %v670_v43  ;;  %v722_v49 = vpack.c.bf16 %v704_v44, %v703_v40 }
 0x132   : > { %v607_v50 = vadd.f32 %v1218_v45, %v1401_v25  ;;  %v598_v59 = vpop.f32.mrb[29].mxu0  ;;  %v721_v60 = vpack.c.bf16 %v702_v48, %v701_v47  ;;  %v1083_v47 = vld [vmem:[%s1566_s4] ss:$0 sm:$0xff] }
 0x133   : > { %v599_v0 = vadd.f32 %v1401_v25, %v598_v59  ;;  %v1219_v51 = vpop.f32.mrb[30].mxu0 }
 0x134   : > { %v675_v52 = vmul.f32 0.1, %v607_v50  ;;  %v610_v53 = vadd.f32 %v1219_v51, %v1401_v25  ;;  %v601_v54 = vpop.f32.mrb[31].mxu0  ;;  %1128 = vmatprep.subr.bf16.mxu1 %v721_v60  ;;  %vm643_vm12 = vcmp.gt.f32.partialorder %v607_v50, 0.0 }
 0x135   : > { %v673_v55 = vmul.f32 0.1, %v599_v0  ;;  %v602_v56 = vadd.f32 %v1401_v25, %v601_v54  ;;  %1129 = vmatpush3.bf16.msra.mxu1 %v713_v18  ;;  %vm641_vm13 = vcmp.gt.f32.partialorder %v599_v0, 0.0  ;;  %v1281_v18 = vld [vmem:[%s1567_s5 + $0x10] ss:$8 sps:$4 sm:$0xff]  }
 0x136   : > { %vm644_vm14 = vcmp.gt.f32.partialorder %v610_v53, 0.0  ;;  %v676_v57 = vmul.f32 0.1, %v610_v53  ;;  %1130 = vmatprep.subr.bf16.mxu1 %v722_v49  ;;  %v707_v58 = vsel %vm643_vm12, %v607_v50, %v675_v52 }
 0x137   : > { %vm642_vm15 = vcmp.gt.f32.partialorder %v602_v56, 0.0  ;;  %v674_v61 = vmul.f32 0.1, %v602_v56  ;;  %v705_v63 = vsel %vm641_vm13, %v599_v0, %v673_v55 }
 0x138   : > { %v708_v62 = vsel %vm644_vm14, %v610_v53, %v676_v57 }
 0x139   : > { %1131 = vmatpush3.bf16.msra.mxu1 %v714_v15  ;;  %v706_v1 = vsel %vm642_vm15, %v602_v56, %v674_v61  ;;  %v724_v2 = vpack.c.bf16 %v708_v62, %v707_v58  ;;  %v1290_v15 = vld [vmem:[%s1565_s3 + $0x10] sm:$0xff]  }
 0x13a   : > { %v723_v25 = vpack.c.bf16 %v706_v1, %v705_v63 }
 0x13c   : > { %1132 = vmatprep.subr.bf16.mxu1 %v723_v25 }
 0x13d   : > { %1133 = vmatpush3.bf16.msra.mxu1 %v715_v37  ;;  %v1292_v37 = vld [vmem:[%s1565_s3 + $0x20] sm:$0xff]  }
 0x13e   : > { %1134 = vmatprep.subr.bf16.mxu1 %v724_v2 }
 0x141   : > { %1135 = vmatpush3.bf16.msra.mxu1 %v716_v34  ;;  %v1287_v34 = vld [vmem:[%s1567_s5 + $0x30] ss:$8 sps:$4 sm:$0xff]  }
 0x142   : > { %1220 = vmatprep.subr.bf16.mxu1 %v1288_v13 }
 0x144   : > { %806 = vmatmul.mubr.bf16.vlgmr.msra.gmra.mrb[0].mxu1 %v1276_v14 }
 0x145   : > { %813 = vmatprep.mubr.bf16.mxu1 %v1279_v10  ;;  %1221 = vmatpush3.bf16.msra.mxu1 %v1288_v13 }
 0x146   : > { %1222 = vmatprep.subr.bf16.mxu1 %v1289_v11 }
 0x149   : > { %1223 = vmatpush3.bf16.msra.mxu1 %v1289_v11 }
 0x14a   : > { %1224 = vmatprep.subr.bf16.mxu1 %v1290_v15 }
 0x14c   : > { %814 = vmatmul.mubr.bf16.gmra.mrb[4].mxu1 %v1281_v18 }
 0x14d   : > { %821 = vmatprep.mubr.bf16.mxu1 %v1282_v29  ;;  %1225 = vmatpush3.bf16.msra.mxu1 %v1290_v15 }
 0x14e   : > { %1226 = vmatprep.subr.bf16.mxu1 %v1291_v30 }
 0x151   : > { %1227 = vmatpush3.bf16.msra.mxu1 %v1291_v30 }
 0x152   : > { %1228 = vmatprep.subr.bf16.mxu1 %v1292_v37 }
 0x154   : > { %822 = vmatmul.mubr.bf16.gmra.mrb[8].mxu1 %v1284_v32 }
 0x155   : > { %829 = vmatprep.mubr.bf16.mxu1 %v1285_v33  ;;  %1229 = vmatpush3.bf16.msra.mxu1 %v1292_v37 }
 0x156   : > { %1230 = vmatprep.subr.bf16.mxu1 %v1293_v3 }
 0x159   : > { %1231 = vmatpush3.bf16.msra.mxu1 %v1293_v3 }
 0x15a   : > { %1232 = vmatprep.subr.bf16.mxu1 %v1294_v4 }
 0x15c   : > { %830 = vmatmul.mubr.bf16.gmra.mrb[12].mxu1 %v1287_v34 }
 0x15d   : > { %1233 = vmatpush3.bf16.msra.mxu1 %v1294_v4 }
 0x15e   : > { %1234 = vmatprep.subr.bf16.mxu1 %v1295_v5 }
 0x161   : > { %1235 = vmatpush3.bf16.msra.mxu1 %v1295_v5 }
 0x217   : > { %v1136_v6 = vpop.f32.mrb[0].mxu1 }
 0x218   : > { %v1137_v7 = vpop.f32.mrb[1].mxu1 }
 0x219   : > { %v1138_v8 = vadd.f32 %v1137_v7, %v1136_v6  ;;  %v1139_v9 = vpop.f32.mrb[2].mxu1 }
 0x21a   : > { %v1140_v12 = vpop.f32.mrb[3].mxu1 }
 0x21b   : > { %v1141_v16 = vadd.f32 %v1140_v12, %v1139_v9 }
 0x21d   : > { %v838_v17 = vpack.c.bf16 %v1141_v16, %v1138_v8 }
 0x21f   : > { %v1142_v19 = vpop.f32.mrb[4].mxu1  ;;  %1236 = vmatprep.mubr.bf16.mxu1 %v838_v17 }
 0x220   : > { %v1143_v20 = vpop.f32.mrb[5].mxu1 }
 0x221   : > { %v1144_v21 = vadd.f32 %v1143_v20, %v1142_v19  ;;  %v1145_v22 = vpop.f32.mrb[6].mxu1 }
 0x222   : > { %v1146_v23 = vpop.f32.mrb[7].mxu1 }
 0x223   : > { %v1147_v24 = vadd.f32 %v1146_v23, %v1145_v22 }
 0x225   : > { %v839_v26 = vpack.c.bf16 %v1147_v24, %v1144_v21 }
 0x227   : > { %v1148_v41 = vpop.f32.mrb[8].mxu1  ;;  %1237 = vmatmul.mubr.bf16.vlgmr.msra.gmra.mrb[16].mxu1 %v839_v26 }
 0x228   : > { %v1149_v42 = vpop.f32.mrb[9].mxu1 }
 0x229   : > { %v1150_v46 = vadd.f32 %v1149_v42, %v1148_v41  ;;  %v1151_v27 = vpop.f32.mrb[10].mxu1 }
 0x22a   : > { %v1152_v28 = vpop.f32.mrb[11].mxu1 }
 0x22b   : > { %v1153_v31 = vadd.f32 %v1152_v28, %v1151_v27 }
 0x22d   : > { %v840_v35 = vpack.c.bf16 %v1153_v31, %v1150_v46 }
 0x22f   : > { %v1154_v36 = vpop.f32.mrb[12].mxu1  ;;  %1240 = vmatprep.mubr.bf16.mxu1 %v840_v35 }
 0x230   : > { %v1155_v38 = vpop.f32.mrb[13].mxu1 }
 0x231   : > { %v1156_v39 = vadd.f32 %v1155_v38, %v1154_v36  ;;  %v1157_v43 = vpop.f32.mrb[14].mxu1 }
 0x232   : > { %v1158_v40 = vpop.f32.mrb[15].mxu1 }
 0x233   : > { %v1159_v44 = vadd.f32 %v1158_v40, %v1157_v43 }
 0x235   : > { %v841_v45 = vpack.c.bf16 %v1159_v44, %v1156_v39 }
 0x237   : > { %1241 = vmatmul.mubr.bf16.gmra.mrb[20].mxu1 %v841_v45 }
 0x2fa   : > { %v1238_v48 = vpop.f32.mrb[16].mxu1 }
 0x2fb   : > { %v956_v49 = vadd.f32 %v1238_v48, %v1083_v47  ;;  %v947_v50 = vpop.f32.mrb[17].mxu1 }
 0x2fc   : > { %v948_v59 = vadd.f32 %v1083_v47, %v947_v50  ;;  %v1239_v60 = vpop.f32.mrb[18].mxu1 }
 0x2fd   : > { %980 = vst [vmem:[%s251_s14 + $0x10] sm:$0xff] %v956_v49  ;;  %v959_v0 = vadd.f32 %v1239_v60, %v1083_v47  ;;  %v950_v51 = vpop.f32.mrb[19].mxu1 }
 0x2fe   : > { %978 = vst [vmem:[%s251_s14] sm:$0xff] %v948_v59  ;;  %v951_v52 = vadd.f32 %v1083_v47, %v950_v51 }
 0x2ff   : > { %981 = vst [vmem:[%s251_s14 + $0x18] sm:$0xff] %v959_v0 }
 0x300   : > { %979 = vst [vmem:[%s251_s14 + $0x8] sm:$0xff] %v951_v52 }
 0x30a   : > { %v1242_v53 = vpop.f32.mrb[20].mxu1 }
 0x30b   : > { %v972_v54 = vadd.f32 %v1242_v53, %v1083_v47  ;;  %v963_v55 = vpop.f32.mrb[21].mxu1 }
 0x30c   : > { %v964_v56 = vadd.f32 %v1083_v47, %v963_v55  ;;  %v1243_v57 = vpop.f32.mrb[22].mxu1 }
 0x30d   : > { %984 = vst [vmem:[%s251_s14 + $0x30] sm:$0xff] %v972_v54  ;;  %v975_v61 = vadd.f32 %v1243_v57, %v1083_v47  ;;  %v966_v58 = vpop.f32.mrb[23].mxu1 }
 0x30e   : > { %982 = vst [vmem:[%s251_s14 + $0x20] sm:$0xff] %v964_v56  ;;  %v967_v62 = vadd.f32 %v1083_v47, %v966_v58 }
 0x30f   : > { %985 = vst [vmem:[%s251_s14 + $0x38] sm:$0xff] %v975_v61 }
 0x310   : > { %983 = vst [vmem:[%s251_s14 + $0x28] sm:$0xff] %v967_v62 }
 0x311 PF: > { %s16_s21 = sadd.s32 1, %s1302_s21  }
 0x312   : > { %p13_p4 = scmp.ge.s32.totalorder %s16_s21, 4  }
 0x314   :  { %15 = sbr.rel (!%p13_p4) target bundleno = 1 (0x1), region = 74 }

</bundles_post_ra>
